<compile_context>
chip_gen: v7x
topology: tpu7x:2x2x1
jax: 0.10.0
libtpu: 0.0.40
codegen_flags: <defaults>
</compile_context>

<pallas_src>
import jax
import jax.numpy as jnp
from jax.experimental import pallas as pl
from jax.experimental.pallas import tpu as pltpu

_LANE = 128
_SUBLANE = 8


def _make_loss_kernel(lamb1, lamb2, n, n_blocks):
    """Builds the kernel with lambdas / N / grid size baked in as constants."""
    inv_n = 1.0 / float(n)
    lamb1 = float(lamb1)
    lamb2 = float(lamb2)

    def kernel(yp_ref, y_ref, w_ref, out_ref, acc_ref):
        i = pl.program_id(0)

        @pl.when(i == 0)
        def _init():
            acc_ref[0] = jnp.float32(0.0)

        # Partial sum of squared errors for this lane-dense block.
        d = yp_ref[...] - y_ref[...]          # (block_rows, 128) f32
        acc_ref[0] += jnp.sum(d * d)

        @pl.when(i == n_blocks - 1)
        def _finalize():
            w = w_ref[...]                    # (h, 128) f32, zero-padded lanes
            t = (w * w) * w - w               # w^3 - w ; (w^3-w)^2 == w^2(w-1)^2(w+1)^2
            reg = (0.5 * lamb2) * jnp.sum(t * t)
            if lamb1 != 0.0:                  # trace-time DCE when lamb1 == 0
                reg = reg + (0.5 * lamb1) * jnp.sum(w * w)
            out_ref[0, 0] = acc_ref[0] * jnp.float32(inv_n) + reg

    return kernel


def pallas_loss(y_pred, y, w_first, lamb1, lamb2):
    """y_pred, y: (N,) f32; w_first: (hidden, in) f32; lamb1, lamb2: python floats."""
    n = int(y_pred.shape[0])

    # --- lane-dense, sublane-filled layout for the batch -------------------
    rows_needed = -(-n // _LANE)                              # ceil(n / 128)
    if rows_needed <= 64:
        block_rows = max(_SUBLANE, -(-rows_needed // _SUBLANE) * _SUBLANE)
    else:
        # 64x128 f32 = 32 KiB per input block; double-buffered x2 inputs
        # stays well under the v7x 32 MiB scoped-VMEM default.
        block_rows = 64
    padded_rows = -(-rows_needed // block_rows) * block_rows
    padded_n = padded_rows * _LANE
    n_blocks = padded_rows // block_rows

    yp2 = jnp.pad(y_pred.astype(jnp.float32).reshape(-1),
                  (0, padded_n - n)).reshape(padded_rows, _LANE)
    y2 = jnp.pad(y.astype(jnp.float32).reshape(-1),
                 (0, padded_n - n)).reshape(padded_rows, _LANE)

    # --- zero-pad weight lanes to a multiple of 128 -------------------------
    h, d = int(w_first.shape[0]), int(w_first.shape[1])
    d_pad = -(-d // _LANE) * _LANE
    w2 = jnp.pad(w_first.astype(jnp.float32), ((0, 0), (0, d_pad - d)))

    kernel = _make_loss_kernel(lamb1, lamb2, n, n_blocks)

    out = pl.pallas_call(
        kernel,
        out_shape=jax.ShapeDtypeStruct((1, 1), jnp.float32),
        grid=(n_blocks,),
        in_specs=[
            pl.BlockSpec((block_rows, _LANE), lambda i: (i, 0)),   # Y_pred blocks
            pl.BlockSpec((block_rows, _LANE), lambda i: (i, 0)),   # Y blocks
            pl.BlockSpec((h, d_pad), lambda i: (0, 0)),            # first weight (resident)
        ],
        out_specs=pl.BlockSpec((1, 1), lambda i: (0, 0),
                               memory_space=pltpu.MemorySpace.SMEM),
        scratch_shapes=[pltpu.SMEM((1,), jnp.float32)],            # running SSE
        compiler_params=pltpu.CompilerParams(
            dimension_semantics=("arbitrary",)),
    )(yp2, y2, w2)
    return out[0, 0]


def _reference_loss(y_pred, y, w, lamb1, lamb2):
    return (jnp.mean((y_pred - y) ** 2)
            + lamb2 / 2 * jnp.sum(w * w * (w - 1) ** 2 * (w + 1) ** 2)
            + lamb1 / 2 * jnp.sum(w * w))


if __name__ == "__main__":
    # Module constants from bpNN.py
    input_neurons = 126
    hidden_neurons = 1
    output_neurons = 1
    lamb1 = 0.0
    lamb2 = 0.001

    key = jax.random.PRNGKey(0)
    kx, ky, kw1, kw2, kbig1, kbig2 = jax.random.split(key, 6)

    # ---- Case 1: small, module-consistent shapes (N=8) ---------------------
    N = 8
    X = jax.random.normal(kx, (N, input_neurons), dtype=jnp.float32)
    Y = jax.random.uniform(ky, (N,), dtype=jnp.float32)

    # Bias-free two-layer net in PyTorch layout (out, in); forward glue in JAX
    # (the forward pass is outside the `Loss` module being translated).
    W1 = jax.random.normal(kw1, (hidden_neurons, input_neurons), dtype=jnp.float32) * 0.05
    W2 = jax.random.normal(kw2, (output_neurons, hidden_neurons), dtype=jnp.float32) * 0.05
    Y_pred = jax.nn.sigmoid((X @ W1.T) @ W2.T)[:, 0]

    loss = pallas_loss(Y_pred, Y, W1, lamb1, lamb2)
    jax.block_until_ready(loss)
    ref = _reference_loss(Y_pred, Y, W1, lamb1, lamb2)
    assert jnp.allclose(loss, ref, rtol=1e-5, atol=1e-6), (loss, ref)

    # ---- Case 2: larger batch to exercise the gridded / pipelined path -----
    N_big = 20000
    Yb_pred = jax.random.uniform(kbig1, (N_big,), dtype=jnp.float32)
    Yb = jax.random.uniform(kbig2, (N_big,), dtype=jnp.float32)
    loss_big = pallas_loss(Yb_pred, Yb, W1, lamb1, lamb2)
    jax.block_until_ready(loss_big)
    ref_big = _reference_loss(Yb_pred, Yb, W1, lamb1, lamb2)
    assert jnp.allclose(loss_big, ref_big, rtol=1e-5, atol=1e-6), (loss_big, ref_big)

    print("KERNEL_OK")
</pallas_src>

<mosaic_0001>
module attributes {stable_mosaic.version = 11 : i64} {
  func.func @kernel(%arg0: i32, %arg1: memref<8x128xf32, #tpu.memory_space<vmem>>, %arg2: memref<8x128xf32, #tpu.memory_space<vmem>>, %arg3: memref<1x128xf32, #tpu.memory_space<vmem>>, %arg4: memref<1x1xf32, #tpu.memory_space<smem>>, %arg5: memref<1xf32, #tpu.memory_space<smem>>) attributes {dimension_semantics = [#tpu.dimension_semantics<arbitrary>], iteration_bounds = array<i64: 1>, scalar_prefetch = 0 : i64, scratch_operands = 1 : i64, tpu.core_type = #tpu.core_type<tc>, window_params = [{transform_indices = @transform_0, window_bounds = array<i64: 8, 128>}, {transform_indices = @transform_1, window_bounds = array<i64: 8, 128>}, {pipeline_mode = #tpu.pipeline_mode<synchronous>, transform_indices = @transform_2, window_bounds = array<i64: 1, 128>}, {transform_indices = @transform_3, window_bounds = array<i64: 1, 1>}]} {
    %c0_i32 = arith.constant 0 : i32
    %0 = arith.cmpi eq, %arg0, %c0_i32 : i32
    %1 = arith.extui %0 : i1 to i32
    %c0_i32_0 = arith.constant 0 : i32
    %2 = arith.cmpi ne, %1, %c0_i32_0 : i32
    scf.if %2 {
      %cst_8 = arith.constant 0.000000e+00 : f32
      %c0_9 = arith.constant 0 : index
      %17 = memref.load %arg5[%c0_9] : memref<1xf32, #tpu.memory_space<smem>>
      memref.store %cst_8, %arg5[%c0_9] : memref<1xf32, #tpu.memory_space<smem>>
    } else {
    }
    %c0 = arith.constant 0 : index
    %c0_1 = arith.constant 0 : index
    %3 = vector.load %arg1[%c0, %c0_1] : memref<8x128xf32, #tpu.memory_space<vmem>>, vector<8x128xf32>
    %c0_2 = arith.constant 0 : index
    %c0_3 = arith.constant 0 : index
    %4 = vector.load %arg2[%c0_2, %c0_3] : memref<8x128xf32, #tpu.memory_space<vmem>>, vector<8x128xf32>
    %5 = arith.subf %3, %4 : vector<8x128xf32>
    %c0_4 = arith.constant 0 : index
    %6 = memref.load %arg5[%c0_4] : memref<1xf32, #tpu.memory_space<smem>>
    %7 = arith.mulf %5, %5 : vector<8x128xf32>
    %8 = vector.shape_cast %7 : vector<8x128xf32> to vector<1x8x128xf32>
    %cst = arith.constant dense<0.000000e+00> : vector<1xf32>
    %9 = vector.multi_reduction <add>, %8, %cst [1, 2] : vector<1x8x128xf32> to vector<1xf32>
    %10 = vector.shape_cast %9 : vector<1xf32> to vector<1x1x1xf32>
    %11 = vector.extract %10[0, 0, 0] : f32 from vector<1x1x1xf32>
    %12 = arith.addf %6, %11 : f32
    %c0_5 = arith.constant 0 : index
    %13 = memref.load %arg5[%c0_5] : memref<1xf32, #tpu.memory_space<smem>>
    memref.store %12, %arg5[%c0_5] : memref<1xf32, #tpu.memory_space<smem>>
    %c0_i32_6 = arith.constant 0 : i32
    %14 = arith.cmpi eq, %arg0, %c0_i32_6 : i32
    %15 = arith.extui %14 : i1 to i32
    %c0_i32_7 = arith.constant 0 : i32
    %16 = arith.cmpi ne, %15, %c0_i32_7 : i32
    scf.if %16 {
      %c0_8 = arith.constant 0 : index
      %c0_9 = arith.constant 0 : index
      %17 = vector.load %arg3[%c0_8, %c0_9] : memref<1x128xf32, #tpu.memory_space<vmem>>, vector<1x128xf32>
      %18 = arith.mulf %17, %17 : vector<1x128xf32>
      %19 = arith.mulf %18, %17 : vector<1x128xf32>
      %20 = arith.subf %19, %17 : vector<1x128xf32>
      %21 = arith.mulf %20, %20 : vector<1x128xf32>
      %22 = vector.shape_cast %21 : vector<1x128xf32> to vector<1x1x128xf32>
      %cst_10 = arith.constant dense<0.000000e+00> : vector<1xf32>
      %23 = vector.multi_reduction <add>, %22, %cst_10 [1, 2] : vector<1x1x128xf32> to vector<1xf32>
      %24 = vector.shape_cast %23 : vector<1xf32> to vector<1x1x1xf32>
      %25 = vector.extract %24[0, 0, 0] : f32 from vector<1x1x1xf32>
      %cst_11 = arith.constant 5.000000e-04 : f32
      %26 = arith.mulf %cst_11, %25 : f32
      %c0_12 = arith.constant 0 : index
      %27 = memref.load %arg5[%c0_12] : memref<1xf32, #tpu.memory_space<smem>>
      %cst_13 = arith.constant 1.250000e-01 : f32
      %28 = arith.mulf %27, %cst_13 : f32
      %29 = arith.addf %28, %26 : f32
      %c0_14 = arith.constant 0 : index
      %c0_15 = arith.constant 0 : index
      %30 = memref.load %arg4[%c0_14, %c0_15] : memref<1x1xf32, #tpu.memory_space<smem>>
      memref.store %29, %arg4[%c0_14, %c0_15] : memref<1x1xf32, #tpu.memory_space<smem>>
    } else {
    }
    return
  }
  func.func @transform_0(%arg0: i32) -> (i32, i32) {
    %c0_i32 = arith.constant 0 : i32
    %c0_i32_0 = arith.constant 0 : i32
    return %arg0, %c0_i32 : i32, i32
  }
  func.func @transform_1(%arg0: i32) -> (i32, i32) {
    %c0_i32 = arith.constant 0 : i32
    %c0_i32_0 = arith.constant 0 : i32
    return %arg0, %c0_i32 : i32, i32
  }
  func.func @transform_2(%arg0: i32) -> (i32, i32) {
    %c0_i32 = arith.constant 0 : i32
    %c0_i32_0 = arith.constant 0 : i32
    %c0_i32_1 = arith.constant 0 : i32
    return %c0_i32, %c0_i32_0 : i32, i32
  }
  func.func @transform_3(%arg0: i32) -> (i32, i32) {
    %c0_i32 = arith.constant 0 : i32
    %c0_i32_0 = arith.constant 0 : i32
    %c0_i32_1 = arith.constant 0 : i32
    return %c0_i32, %c0_i32_0 : i32, i32
  }
}

</mosaic_0001>

<bundles_post_ra>
// kernel: tpu_custom_call.1
= control target key start
LH: loop header
LB: loop body
LE: loop exit
PB: predicated region body
PF: predicated region fallthrough
CT: control target
= control target key end

     0   :  { %8 = vsyncpa [#allocation4], 0  ;;  %s231_s0 = inlined_call_operand.hbm [shape: f32[8,128], index: 0, kind: input, shape index: {}]   ;;  %s232_s1 = inlined_call_operand.hbm [shape: f32[8,128], index: 1, kind: input, shape index: {}]   ;;  %s233_s2 = inlined_call_operand.vmem [shape: f32[1,128], index: 2, kind: input, shape index: {}]   ;;  %s234_s3 = inlined_call_operand.hbm [shape: f32[1,1], index: 3, kind: output, shape index: {}]  }
   0x1   :  { %9 = vsyncpa [#allocation7], 0 }
   0x2   :  { %10 = vsyncpa [#allocation5], 0  ;;  %s169_s12 = smov [#allocation3]   ;;  %s170_s14 = smov [#allocation6]  }
   0x3   :  { %s17_s13 = sshll.u32 %s169_s12, 4  ;;  %s27_s15 = sshll.u32 %s170_s14, 4  ;;  %s18_s13 = int_to_ptr.vmem [resolvable:$true] %s17_s13  ;;  %s28_s15 = int_to_ptr.vmem [resolvable:$true] %s27_s15 }
   0x4   :  { %s109_s18 = scalar_lea.hbm %s231_s0, 128 }
   0x5   :  { %p110_p0 = scmp.ne.s32.totalorder %s231_s0, %s109_s18  ;;  %p113_p1 = scmp.lt.u32.totalorder %s109_s18, %s231_s0 }
   0x7   :  { %p115_p2 = pnand %p113_p1, %p110_p0 }
   0x9   :  { %118 = shalt.err (!%p115_p2)
}
   0xa   :  { %s119_s23 = scalar_lea.vmem %s18_s13, 128  ;;  %p124_p4 = scmp.lt.s32.totalorder %s18_s13, %s18_s13 }
   0xb   :  { %p120_p3 = scmp.ne.s32.totalorder %s18_s13, %s119_s23  ;;  %p125_p5 = scmp.lt.s32.totalorder %s119_s23, %s119_s23 }
   0xd   :  { %p126_p6 = por %p125_p5, %p124_p4 }
   0xf   :  { %p127_p7 = pnand %p126_p6, %p120_p3 }
  0x11   :  { %130 = shalt.err (!%p127_p7)
}
  0x12   :  { %20 = dma.hbm_to_vmem [thread:$0]  %s231_s0, 128, %s18_s13, [#allocation4]  }
  0x13   :  { %s131_s28 = scalar_lea.hbm %s232_s1, 128 }
  0x14   :  { %p132_p8 = scmp.ne.s32.totalorder %s232_s1, %s131_s28  ;;  %p135_p9 = scmp.lt.u32.totalorder %s131_s28, %s232_s1 }
  0x16   :  { %p137_p10 = pnand %p135_p9, %p132_p8 }
  0x18   :  { %140 = shalt.err (!%p137_p10)
}
  0x19   :  { %s141_s6 = scalar_lea.vmem %s28_s15, 128  ;;  %p146_p12 = scmp.lt.s32.totalorder %s28_s15, %s28_s15 }
  0x1a   :  { %p142_p11 = scmp.ne.s32.totalorder %s28_s15, %s141_s6  ;;  %p147_p13 = scmp.lt.s32.totalorder %s141_s6, %s141_s6 }
  0x1c   :  { %p148_p0 = por %p147_p13, %p146_p12 }
  0x1e   :  { %p149_p1 = pnand %p148_p0, %p142_p11 }
  0x20   :  { %152 = shalt.err (!%p149_p1)
}
  0x21   :  { %30 = dma.hbm_to_vmem [thread:$0]  %s232_s1, 128, %s28_s15, [#allocation7]  }
  0x22   :  { %163 = dma.done.wait [#allocation4], 128  }
  0x23   :  { %164 = vsyncadd [#allocation4], 4294967168 }
  0x24   :  { %165 = dma.done.wait [#allocation7], 128  }
  0x25   :  { %166 = vsyncadd [#allocation7], 4294967168  ;;  %v45_v0 = vld [vmem:[#allocation3] sm:$0xff]  ;;  %v46_v1 = vld [vmem:[#allocation6] sm:$0xff]  ;;  %vm70_vm0 = vcmask 1040384   ;;  %s153_s15 = scalar_lea.hbm %s234_s3, 16 }
  0x26   :  { %v65_v2 = vld [vmem:[%s233_s2] sm:$0x1]  ;;  %v47_v3 = vsub.f32 %v45_v0, %v46_v1  ;;  %p154_p2 = scmp.ne.s32.totalorder %s234_s3, %s153_s15  ;;  %p157_p3 = scmp.lt.u32.totalorder %s153_s15, %s234_s3 }
  0x27   :  { %v66_v4 = vmul.f32 %v65_v2, %v65_v2 }
  0x28   :  { %v49_v5 = vmul.f32 %v47_v3, %v47_v3  ;;  %p159_p4 = pnand %p157_p3, %p154_p2 }
  0x29   :  { %v67_v6 = vmul.f32 %v66_v4, %v65_v2 }
  0x2a   :  { %50 = vadd.xlane.f32.xlu0 %v49_v5 }
  0x2b   :  { %v68_v7 = vsub.f32 %v67_v6, %v65_v2 }
  0x2d   :  { %v69_v8 = vmul.f32 %v68_v7, %v68_v7 }
  0x2f   :  { %v71_v9 = vsel %vm70_vm0, %v69_v8, 0.0 }
  0x30   :  { %72 = vadd.xlane.f32.xlu0 %v71_v9 }
  0xb7   :  { %v51_v10 = vpop.xlane.xlu0 %50 }
  0xb8   :  { %v52_v11 = vrot.slane %v51_v10, 4 }
  0xba   :  { %v53_v12 = vadd.f32 %v52_v11, %v51_v10 }
  0xbc   :  { %v54_v13 = vrot.slane %v53_v12, 2 }
  0xbd   :  { %v73_v14 = vpop.xlane.xlu0 %72 }
  0xbe   :  { %v74_v15 = vrot.slane %v73_v14, 4  ;;  %v55_v16 = vadd.f32 %v54_v13, %v53_v12 }
  0xc0   :  { %v75_v17 = vadd.f32 %v74_v15, %v73_v14  ;;  %v56_v18 = vrot.slane %v55_v16, 1 }
  0xc2   :  { %v76_v19 = vrot.slane %v75_v17, 2  ;;  %v57_v20 = vadd.f32 %v56_v18, %v55_v16 }
  0xc4   :  { %v77_v21 = vadd.f32 %v76_v19, %v75_v17  ;;  %102 = vpush %v57_v20 }
  0xc6   :  { %v78_v22 = vrot.slane %v77_v21, 1 }
  0xc8   :  { %v79_v23 = vadd.f32 %v78_v22, %v77_v21 }
  0xca   :  { %104 = vpush %v79_v23 }
  0xf5   :  { %s103_s1 = spop %102 }
  0xf6   :  { %s83_s2 = smul.f32 0.125, %s103_s1 }
  0xfb   :  { %s105_s10 = spop %104 }
  0xfc   :  { %s81_s11 = smul.f32 0.0005, %s105_s10 }
  0xfe   :  { %s84_s12 = sadd.f32 %s83_s2, %s81_s11 }
 0x100   :  { %86 = sst [smem:[#allocation8]] %s84_s12 }
 0x101   :  { %162 = shalt.err (!%p159_p4)
}
 0x102   :  { %s171_s20 = smov [#allocation8]  }
 0x103   :  { %94 = dma.smem_to_hbm %s171_s20, 16, %s234_s3, [#allocation5]  }
 0x104   :  { %167 = dma.done.wait [#allocation5], 16  }
 0x105   :  { %168 = vsyncadd [#allocation5], 4294967280 }
 0x106   :  { %98 = sfence }
 0x107   :  { %99 = vsyncpa [#allocation4], 1 }
 0x108   :  { %100 = vsyncpa [#allocation7], 1 }
 0x109   :  { %101 = vsyncpa [#allocation5], 1 }

</bundles_post_ra>
